<compile_context>
chip_gen: v6e
topology: v6e:2x2x1
jax: 0.10.0
libtpu: 0.0.40
codegen_flags: <defaults>
</compile_context>

<pallas_src>
import math

import jax
import jax.numpy as jnp
from jax import lax
from jax.experimental import pallas as pl
from jax.experimental.pallas import tpu as pltpu


# ------------------------------ helpers -------------------------------------

def _round_up(a, b):
    return (a + b - 1) // b * b


def _derive_tiles(B, K, N, dtype, vmem_budget=24 * 1024 * 1024):
    """Pick (tm, tn, tk) and padded extents.  Largest tile that fits the
    budget wins; dims are padded UP to a tile multiple (zero pad is inert)."""
    itemsize = jnp.dtype(dtype).itemsize
    sublane = {4: 8, 2: 16, 1: 32}.get(itemsize, 8)   # dtype-aware sublane align

    tm = min(_round_up(B, sublane), 256)
    tn = min(_round_up(N, 128), 512)
    tk = min(_round_up(K, 128), 2048)

    def vmem_bytes(tm_, tn_, tk_):
        # double-buffered inputs/outputs + f32 accumulator (worst case)
        return (2 * tm_ * tk_ * itemsize          # x tiles
                + 2 * tn_ * tk_ * itemsize        # weight tiles
                + 2 * tn_ * itemsize              # bias tiles
                + 2 * tm_ * tn_ * itemsize        # output tiles
                + tm_ * tn_ * 4)                  # accumulator

    while vmem_bytes(tm, tn, tk) > vmem_budget and tk > 512:
        tk = max(512, _round_up(tk // 2, 128))
    while vmem_bytes(tm, tn, tk) > vmem_budget and tn > 128:
        tn = max(128, _round_up(tn // 2, 128))
    while vmem_bytes(tm, tn, tk) > vmem_budget and tm > sublane:
        tm = max(sublane, _round_up(tm // 2, sublane))

    Mp = _round_up(B, tm)
    Np = _round_up(N, tn)
    Kp = _round_up(K, tk)
    return tm, tn, tk, Mp, Np, Kp


# ----------------------------- Pallas kernels --------------------------------

def _linear_nt_kernel(x_ref, w_ref, b_ref, o_ref):
    # Single-K-step variant: x [tm, K], w [tn, K] (native layout), b [1, tn].
    acc = lax.dot_general(
        x_ref[...], w_ref[...],
        dimension_numbers=(((1,), (1,)), ((), ())),
        preferred_element_type=jnp.float32)
    o_ref[...] = (acc + b_ref[...].astype(jnp.float32)).astype(o_ref.dtype)


def _linear_nt_acc_kernel(x_ref, w_ref, b_ref, o_ref, acc_ref):
    # Multi-K-step variant with f32 VMEM accumulator.
    k = pl.program_id(2)

    @pl.when(k == 0)
    def _():
        acc_ref[...] = jnp.zeros_like(acc_ref)

    acc_ref[...] += lax.dot_general(
        x_ref[...], w_ref[...],
        dimension_numbers=(((1,), (1,)), ((), ())),
        preferred_element_type=jnp.float32)

    @pl.when(k == pl.num_programs(2) - 1)
    def _():
        o_ref[...] = (acc_ref[...] + b_ref[...].astype(jnp.float32)
                      ).astype(o_ref.dtype)


def pallas_linear(x, weight, bias):
    """y = x @ weight.T + bias (PyTorch F.linear semantics), tiled Pallas matmul.

    weight is consumed in its native [N, K] layout (no HBM transpose)."""
    B, K = x.shape
    N, K2 = weight.shape
    assert K == K2 and bias.shape == (N,)
    out_dtype = x.dtype

    tm, tn, tk, Mp, Np, Kp = _derive_tiles(B, K, N, x.dtype)

    # Aligned fast-paths: skip the pad copies entirely when already aligned.
    if (Mp, Kp) == (B, K):
        x_p = x
    else:
        x_p = jnp.zeros((Mp, Kp), x.dtype).at[:B, :K].set(x)
    if (Np, Kp) == (N, K):
        w_p = weight
    else:
        w_p = jnp.zeros((Np, Kp), weight.dtype).at[:N, :K].set(weight)
    if Np == N:
        b_p = bias.reshape(1, N)
    else:
        b_p = jnp.zeros((1, Np), bias.dtype).at[0, :N].set(bias)

    gm, gn, gk = Mp // tm, Np // tn, Kp // tk

    cost = pl.CostEstimate(
        flops=2 * Mp * Np * Kp,
        transcendentals=0,
        bytes_accessed=(x_p.size * x_p.dtype.itemsize
                        + w_p.size * w_p.dtype.itemsize
                        + b_p.size * b_p.dtype.itemsize
                        + Mp * Np * jnp.dtype(out_dtype).itemsize),
    )

    if gk == 1:
        # K fits one tile: no accumulator, no reduction axis, direct store.
        grid = (gm, gn)
        in_specs = [
            pl.BlockSpec((tm, tk), lambda i, j: (i, 0)),   # x
            pl.BlockSpec((tn, tk), lambda i, j: (j, 0)),   # weight [N, K]
            pl.BlockSpec((1, tn), lambda i, j: (0, j)),    # bias
        ]
        out_specs = pl.BlockSpec((tm, tn), lambda i, j: (i, j))
        kernel = _linear_nt_kernel
        scratch = []
        # Megacore: gm/gn > 1 only when the head is big enough to need >1 max
        # tile; tiny heads keep a (1,1) grid on purpose (latency-bound).
        dims = ("parallel", "parallel")
    else:
        grid = (gm, gn, gk)
        in_specs = [
            pl.BlockSpec((tm, tk), lambda i, j, k: (i, k)),   # x
            pl.BlockSpec((tn, tk), lambda i, j, k: (j, k)),   # weight [N, K]
            pl.BlockSpec((1, tn), lambda i, j, k: (0, j)),    # bias
        ]
        out_specs = pl.BlockSpec((tm, tn), lambda i, j, k: (i, j))
        kernel = _linear_nt_acc_kernel
        scratch = [pltpu.VMEM((tm, tn), jnp.float32)]
        dims = ("parallel", "parallel", "arbitrary")

    out_p = pl.pallas_call(
        kernel,
        out_shape=jax.ShapeDtypeStruct((Mp, Np), out_dtype),
        grid_spec=pltpu.PrefetchScalarGridSpec(
            num_scalar_prefetch=0,
            grid=grid,
            in_specs=in_specs,
            out_specs=out_specs,
            scratch_shapes=scratch,
        ),
        compiler_params=pltpu.CompilerParams(
            dimension_semantics=dims,
            vmem_limit_bytes=32 * 1024 * 1024,   # safe on v5e/v6e/v7x
        ),
        cost_estimate=cost,
    )(x_p, w_p, b_p)

    if (Mp, Np) == (B, N):
        return out_p
    return out_p[:B, :N]


# ------------------------ Linear_mine (JAX version) --------------------------

class LinearMine:
    def __init__(self, in_dim, out_dim, class_per_task, key):
        self.in_dim = in_dim
        self.out_dim = out_dim
        self.task_class_num = class_per_task

        # nn.Linear(in_dim, class_per_task) default init: U(-1/sqrt(in_dim), ...)
        kw, kb = jax.random.split(key)
        bound = 1.0 / math.sqrt(in_dim)
        w_init = jax.random.uniform(
            kw, (class_per_task, in_dim), jnp.float32, -bound, bound)
        b_init = jax.random.uniform(
            kb, (class_per_task,), jnp.float32, -bound, bound)

        # __init__ replicates the per-task block across all tasks.
        n_tasks = out_dim // class_per_task
        self.weight = jnp.tile(w_init, (n_tasks, 1))   # [out_dim, in_dim]
        self.bias = jnp.tile(b_init, (n_tasks,))        # [out_dim]

    def forward(self, x, class_min_output, class_max_output):
        # Validate like torch: class_min + class_max must cover range(out_dim)
        # (slice_before.index(i) raises ValueError otherwise).
        slice_before = list(class_min_output) + list(class_max_output)
        _ = [slice_before.index(i) for i in range(self.out_dim)]

        # The original gather -> concat -> re-permute reconstructs the original
        # row order exactly; only the stop_gradient placement differs.  A
        # per-row mask is equivalent (same forward values AND same gradients)
        # and avoids several weight-sized HBM passes on the hot path.
        min_idx = jnp.asarray(list(class_min_output), dtype=jnp.int32)
        min_mask = jnp.zeros((self.out_dim,), jnp.bool_).at[min_idx].set(True)
        w = jnp.where(min_mask[:, None], lax.stop_gradient(self.weight), self.weight)
        b = jnp.where(min_mask, lax.stop_gradient(self.bias), self.bias)

        # Hot path: F.linear(input, weight, bias) in Pallas (weight stays [N, K]).
        return pallas_linear(x, w, b)


# --------------------------------- main --------------------------------------

def _reference_linear(x, model, class_min_output, class_max_output):
    # Faithful re-implementation of the torch forward for checking.
    slice_before = list(class_min_output) + list(class_max_output)
    slice_idx = [slice_before.index(i) for i in range(model.out_dim)]
    w_ref = jnp.concatenate(
        [model.weight[jnp.asarray(class_min_output)],
         model.weight[jnp.asarray(class_max_output)]], axis=0)[jnp.asarray(slice_idx)]
    b_ref = jnp.concatenate(
        [model.bias[jnp.asarray(class_min_output)],
         model.bias[jnp.asarray(class_max_output)]], axis=0)[jnp.asarray(slice_idx)]
    return x @ w_ref.T + b_ref


if __name__ == "__main__":
    key = jax.random.PRNGKey(0)

    # ---- test 1: tiny classifier (matches original toy sizes) --------------
    k_param, k_x, key = jax.random.split(key, 3)
    B, in_dim, out_dim, class_per_task = 4, 32, 16, 4
    model = LinearMine(in_dim, out_dim, class_per_task, k_param)
    x = jax.random.normal(k_x, (B, in_dim), jnp.float32)
    class_min_output = list(range(0, 8))
    class_max_output = list(range(8, 16))

    y = jax.block_until_ready(model.forward(x, class_min_output, class_max_output))
    y_ref = _reference_linear(x, model, class_min_output, class_max_output)
    assert y.shape == (B, out_dim)
    assert jnp.allclose(y, y_ref, atol=1e-5, rtol=1e-5)

    # ---- test 2: ViT/CODA-like classifier sizes (aligned K fast path) ------
    k_param2, k_x2, key = jax.random.split(key, 3)
    B2, in_dim2, out_dim2, cpt2 = 16, 768, 40, 4
    model2 = LinearMine(in_dim2, out_dim2, cpt2, k_param2)
    x2 = jax.random.normal(k_x2, (B2, in_dim2), jnp.float32)
    cmin2 = list(range(0, 20))
    cmax2 = list(range(20, 40))

    y2 = jax.block_until_ready(model2.forward(x2, cmin2, cmax2))
    y2_ref = _reference_linear(x2, model2, cmin2, cmax2)
    assert y2.shape == (B2, out_dim2)
    assert jnp.allclose(y2, y2_ref, atol=1e-4, rtol=1e-4)

    # TODO(synk): at very large out_dim, fold row selection into the weight
    # BlockSpec via PrefetchScalarGridSpec scalar-prefetched indices instead
    # of the (already cheap) wrapper-level mask.

    print("KERNEL_OK")
</pallas_src>

<mosaic_0001>
module attributes {stable_mosaic.version = 11 : i64} {
  func.func @_linear_nt_kernel(%arg0: i32, %arg1: i32, %arg2: memref<8x128xf32, #tpu.memory_space<vmem>>, %arg3: memref<128x128xf32, #tpu.memory_space<vmem>>, %arg4: memref<1x128xf32, #tpu.memory_space<vmem>>, %arg5: memref<8x128xf32, #tpu.memory_space<vmem>>) attributes {dimension_semantics = [#tpu.dimension_semantics<parallel>, #tpu.dimension_semantics<parallel>], iteration_bounds = array<i64: 1, 1>, scalar_prefetch = 0 : i64, scratch_operands = 0 : i64, tpu.core_type = #tpu.core_type<tc>, window_params = [{transform_indices = @transform_0, window_bounds = array<i64: 8, 128>}, {transform_indices = @transform_1, window_bounds = array<i64: 128, 128>}, {transform_indices = @transform_2, window_bounds = array<i64: 1, 128>}, {transform_indices = @transform_3, window_bounds = array<i64: 8, 128>}]} {
    %c0 = arith.constant 0 : index
    %c0_0 = arith.constant 0 : index
    %0 = vector.load %arg2[%c0, %c0_0] : memref<8x128xf32, #tpu.memory_space<vmem>>, vector<8x128xf32>
    %c0_1 = arith.constant 0 : index
    %c0_2 = arith.constant 0 : index
    %1 = vector.load %arg3[%c0_1, %c0_2] : memref<128x128xf32, #tpu.memory_space<vmem>>, vector<128x128xf32>
    %cst = arith.constant dense<0.000000e+00> : vector<8x128xf32>
    %2 = tpu.matmul %0, %1, %cst {dimension_numbers = #tpu.dot_dimension_numbers<[1], [1], [0], [0], [0, 0, 1, 0], [], []>} : vector<8x128xf32>, vector<128x128xf32>, vector<8x128xf32> -> vector<8x128xf32>
    %c0_3 = arith.constant 0 : index
    %c0_4 = arith.constant 0 : index
    %3 = vector.load %arg4[%c0_3, %c0_4] : memref<1x128xf32, #tpu.memory_space<vmem>>, vector<1x128xf32>
    %4 = vector.broadcast %3 : vector<1x128xf32> to vector<8x128xf32>
    %5 = arith.addf %2, %4 : vector<8x128xf32>
    %c0_5 = arith.constant 0 : index
    %c0_6 = arith.constant 0 : index
    %6 = vector.load %arg5[%c0_5, %c0_6] : memref<8x128xf32, #tpu.memory_space<vmem>>, vector<8x128xf32>
    tpu.vector_store %arg5[%c0_5, %c0_6], %5 {strides = array<i32>} : memref<8x128xf32, #tpu.memory_space<vmem>>, vector<8x128xf32>,
    return
  }
  func.func @transform_0(%arg0: i32, %arg1: i32) -> (i32, i32) {
    %c0_i32 = arith.constant 0 : i32
    %c0_i32_0 = arith.constant 0 : i32
    return %arg0, %c0_i32 : i32, i32
  }
  func.func @transform_1(%arg0: i32, %arg1: i32) -> (i32, i32) {
    %c0_i32 = arith.constant 0 : i32
    %c0_i32_0 = arith.constant 0 : i32
    return %arg1, %c0_i32 : i32, i32
  }
  func.func @transform_2(%arg0: i32, %arg1: i32) -> (i32, i32) {
    %c0_i32 = arith.constant 0 : i32
    %c0_i32_0 = arith.constant 0 : i32
    return %c0_i32, %arg1 : i32, i32
  }
  func.func @transform_3(%arg0: i32, %arg1: i32) -> (i32, i32) {
    %c0_i32 = arith.constant 0 : i32
    return %arg0, %arg1 : i32, i32
  }
}

</mosaic_0001>

<bundles_post_ra>
// kernel: tpu_custom_call.1
= control target key start
LH: loop header
LB: loop body
LE: loop exit
PB: predicated region body
PF: predicated region fallthrough
CT: control target
= control target key end

     0   :  { %8 = vsyncpa [#allocation3], 0  ;;  %s317_s0 = inlined_call_operand.hbm [shape: f32[8,128], index: 0, kind: input, shape index: {}]   ;;  %s318_s1 = inlined_call_operand.hbm [shape: f32[128,128], index: 1, kind: input, shape index: {}]   ;;  %s319_s2 = inlined_call_operand.vmem [shape: f32[1,128], index: 2, kind: input, shape index: {}]   ;;  %s320_s3 = inlined_call_operand.hbm [shape: f32[8,128], index: 3, kind: output, shape index: {}]  }
   0x1   :  { %9 = vsyncpa [#allocation6], 0 }
   0x2   :  { %10 = vsyncpa [#allocation4], 0  ;;  %s278_s12 = smov [#allocation2]   ;;  %s279_s14 = smov [#allocation5]  }
   0x3   :  { %s17_s13 = sshll.u32 %s278_s12, 4  ;;  %s26_s15 = sshll.u32 %s279_s14, 4  ;;  %s18_s13 = int_to_ptr.vmem [resolvable:$true] %s17_s13  ;;  %s27_s15 = int_to_ptr.vmem [resolvable:$true] %s26_s15 }
   0x4   :  { %s220_s16 = scalar_lea.vmem %s18_s13, 128  ;;  %p225_p1 = scmp.lt.s32.totalorder %s18_s13, %s18_s13 }
   0x5   :  { %p221_p0 = scmp.ne.s32.totalorder %s18_s13, %s220_s16  ;;  %p226_p2 = scmp.lt.s32.totalorder %s220_s16, %s220_s16 }
   0x7   :  { %p227_p3 = por %p226_p2, %p225_p1 }
   0x9   :  { %p228_p4 = pnand %p227_p3, %p221_p0 }
   0xb   :  { %231 = shalt.err (!%p228_p4)
}
   0xc   :  { %20 = dma.hbm_to_vmem [thread:$0]  %s317_s0, 128, %s18_s13, [#allocation3]  }
   0xd   :  { %s240_s19 = scalar_lea.vmem %s27_s15, 2048  ;;  %p245_p6 = scmp.lt.s32.totalorder %s27_s15, %s27_s15 }
   0xe   :  { %p241_p5 = scmp.ne.s32.totalorder %s27_s15, %s240_s19  ;;  %p246_p7 = scmp.lt.s32.totalorder %s240_s19, %s240_s19 }
  0x10   :  { %p247_p8 = por %p246_p7, %p245_p6 }
  0x12   :  { %p248_p9 = pnand %p247_p8, %p241_p5 }
  0x14   :  { %251 = shalt.err (!%p248_p9)
}
  0x15   :  { %s280_s20 = smov 128   ;;  %s281_s21 = smov 8  }
  0x16   :  { %32 = dma.hbm_to_vmem [thread:$0]  %s318_s1, 2048, %s27_s15, [#allocation6], %s280_s20, %s280_s20, %s281_s21  }
  0x17   :  { %272 = dma.done.wait [#allocation3], 128  }
  0x18   :  { %273 = vsyncadd [#allocation3], 4294967168 }
  0x19   :  { %274 = dma.done.wait [#allocation6], 2048  }
  0x1a   :  { %275 = vsyncadd [#allocation6], 4294965248  ;;  %v282_v0 = vmov 0.0   ;;  %vm283_vm0 = vmmov 0   ;;  %v57_v1 = vld [vmem:[#allocation5 + $0x78] sm:$0xff]  ;;  %v56_v2 = vld [vmem:[#allocation5 + $0x70] sm:$0xff] }
  0x1b   :  { %170 = vmatprep.subr.mxu0 %v282_v0  ;;  %202 = vmatprep.mubr.msk.f32.mxu0 %vm283_vm0, %v282_v0  ;;  %v55_v3 = vld [vmem:[#allocation5 + $0x68] sm:$0xff]  ;;  %v54_v4 = vld [vmem:[#allocation5 + $0x60] sm:$0xff]  ;;  %v53_v5 = vld [vmem:[#allocation5 + $0x58] sm:$0xff]  ;;  %s284_s24 = smov [#allocation7]  }
  0x1c   :  { %171 = vmatpush3.xpose.msra.mxu0 %v57_v1  ;;  %v52_v6 = vld [vmem:[#allocation5 + $0x50] sm:$0xff]  ;;  %v51_v7 = vld [vmem:[#allocation5 + $0x48] sm:$0xff]  ;;  %v50_v8 = vld [vmem:[#allocation5 + $0x40] sm:$0xff]  ;;  %s142_s25 = sshll.u32 %s284_s24, 4  ;;  %s143_s25 = int_to_ptr.vmem [resolvable:$true] %s142_s25 }
  0x1d   :  { %172 = vmatprep.subr.mxu0 %v282_v0  ;;  %v49_v9 = vld [vmem:[#allocation5 + $0x38] sm:$0xff]  ;;  %v48_v10 = vld [vmem:[#allocation5 + $0x30] sm:$0xff]  ;;  %v47_v11 = vld [vmem:[#allocation5 + $0x28] sm:$0xff]  ;;  %s252_s26 = scalar_lea.vmem %s143_s25, 128  ;;  %p257_p11 = scmp.lt.s32.totalorder %s143_s25, %s143_s25 }
  0x1e   :  { %v46_v12 = vld [vmem:[#allocation5 + $0x20] sm:$0xff]  ;;  %v45_v13 = vld [vmem:[#allocation5 + $0x18] sm:$0xff]  ;;  %v44_v14 = vld [vmem:[#allocation5 + $0x10] sm:$0xff]  ;;  %p253_p10 = scmp.ne.s32.totalorder %s143_s25, %s252_s26  ;;  %p258_p12 = scmp.lt.s32.totalorder %s252_s26, %s252_s26 }
  0x1f   :  { %v43_v15 = vld [vmem:[#allocation5 + $0x8] sm:$0xff]  ;;  %v42_v16 = vld [vmem:[#allocation5] sm:$0xff]  ;;  %v41_v17 = vld [vmem:[#allocation2] sm:$0xff] }
  0x20   :  { %173 = vmatpush3.xpose.msra.mxu0 %v56_v2  ;;  %v152_v18 = vld [vmem:[%s319_s2] ss:$0 sm:$0xff]  ;;  %p259_p13 = por %p258_p12, %p257_p11 }
  0x21   :  { %174 = vmatprep.subr.mxu0 %v282_v0 }
  0x22   :  { %p260_p0 = pnand %p259_p13, %p253_p10 }
  0x24   :  { %175 = vmatpush3.xpose.msra.mxu0 %v55_v3 }
  0x25   :  { %176 = vmatprep.subr.mxu0 %v282_v0 }
  0x28   :  { %177 = vmatpush3.xpose.msra.mxu0 %v54_v4 }
  0x29   :  { %178 = vmatprep.subr.mxu0 %v282_v0 }
  0x2c   :  { %179 = vmatpush3.xpose.msra.mxu0 %v53_v5 }
  0x2d   :  { %180 = vmatprep.subr.mxu0 %v282_v0 }
  0x30   :  { %181 = vmatpush3.xpose.msra.mxu0 %v52_v6 }
  0x31   :  { %182 = vmatprep.subr.mxu0 %v282_v0 }
  0x34   :  { %183 = vmatpush3.xpose.msra.mxu0 %v51_v7 }
  0x35   :  { %184 = vmatprep.subr.mxu0 %v282_v0 }
  0x38   :  { %185 = vmatpush3.xpose.msra.mxu0 %v50_v8 }
  0x39   :  { %186 = vmatprep.subr.mxu0 %v282_v0 }
  0x3c   :  { %187 = vmatpush3.xpose.msra.mxu0 %v49_v9 }
  0x3d   :  { %188 = vmatprep.subr.mxu0 %v282_v0 }
  0x40   :  { %189 = vmatpush3.xpose.msra.mxu0 %v48_v10 }
  0x41   :  { %190 = vmatprep.subr.mxu0 %v282_v0 }
  0x44   :  { %191 = vmatpush3.xpose.msra.mxu0 %v47_v11 }
  0x45   :  { %192 = vmatprep.subr.mxu0 %v282_v0 }
  0x48   :  { %193 = vmatpush3.xpose.msra.mxu0 %v46_v12 }
  0x49   :  { %194 = vmatprep.subr.mxu0 %v282_v0 }
  0x4c   :  { %195 = vmatpush3.xpose.msra.mxu0 %v45_v13 }
  0x4d   :  { %196 = vmatprep.subr.mxu0 %v282_v0 }
  0x50   :  { %197 = vmatpush3.xpose.msra.mxu0 %v44_v14 }
  0x51   :  { %198 = vmatprep.subr.mxu0 %v282_v0 }
  0x54   :  { %199 = vmatpush3.xpose.msra.mxu0 %v43_v15 }
  0x55   :  { %200 = vmatprep.subr.mxu0 %v282_v0 }
  0x58   :  { %201 = vmatpush3.xpose.msra.mxu0 %v42_v16 }
  0x5b   :  { %203 = vmatmul.mubr.f32.vlgmr.msra.gmra.mxu0 %v41_v17 }
 0x11b   :  { %v131_v19 = vpop.f32.mrf.mxu0 }
 0x11c   :  { %v132_v20 = vadd.f32 %v152_v18, %v131_v19 }
 0x11d   :  { %v204_v21 = vpop.f32.mrf.mxu0 }
 0x11e   :  { %135 = vst [vmem:[#allocation7] sm:$0xff] %v132_v20 }
 0x11f   :  { %263 = shalt.err (!%p260_p0)
}
 0x120   :  { %145 = dma.vmem_to_hbm [thread:$0]  %s143_s25, 128, %s320_s3, [#allocation4]  }
 0x121   :  { %276 = dma.done.wait [#allocation4], 128  }
 0x122   :  { %277 = vsyncadd [#allocation4], 4294967168 }
 0x123   :  { %149 = vsyncpa [#allocation3], 1 }
 0x124   :  { %150 = vsyncpa [#allocation6], 1 }
 0x125   :  { %151 = vsyncpa [#allocation4], 1 }

</bundles_post_ra>
